<compile_context>
chip_gen: v7x
topology: tpu7x:2x2x1
jax: 0.10.0
libtpu: 0.0.40
codegen_flags: <defaults>
</compile_context>

<pallas_src>
import jax
import jax.numpy as jnp
from jax.experimental import pallas as pl
from jax.experimental.pallas import tpu as pltpu


def _round_up(v, m):
    return ((v + m - 1) // m) * m


def _validate_linear_input(in_features, out_features, rank, symmetric):
    if rank >= min(in_features, out_features):
        raise ValueError("`rank` is greater or equal to both `in_features` and `out_features`")
    if symmetric and in_features != out_features:
        raise ValueError("Cannot have `symmetric` when `in_features != out_features`")
    num_full = in_features * out_features
    num_low = rank * (in_features + out_features)
    if symmetric:
        num_low //= 2
    if num_low >= num_full:
        raise ValueError("Low-rank setup has more parameters than full-rank setup.")


def _vmem_policy():
    """(streaming budget bytes, vmem_limit cap bytes) per TPU generation."""
    cap_bytes = None
    try:
        cap_bytes = getattr(pltpu.get_tpu_info(), "vmem_capacity_bytes", None)
    except Exception:
        cap_bytes = None
    if cap_bytes is None:
        cap_bytes = 128 * 2 ** 20
    if cap_bytes >= 100 * 2 ** 20:          # v5e / v6e: 128 MiB physical VMEM
        return 48 * 2 ** 20, 100 * 2 ** 20
    return 24 * 2 ** 20, 48 * 2 ** 20        # v7x: 64 MiB per TensorCore


def _pick_bn(out_p, bn_cap):
    """Largest multiple of 128 that divides out_p and is <= bn_cap."""
    q = out_p // 128
    cap = max(bn_cap // 128, 1)
    for d in range(min(cap, q), 0, -1):
        if q % d == 0:
            return d * 128
    return 128


def _padded_bytes(rows, cols, itemsize):
    return _round_up(max(rows, 1), 8) * _round_up(max(cols, 1), 128) * itemsize


def _make_kernel(has_bias, compute_dtype, multi_n):
    def matmul1(x_ref, a_ref):
        x = x_ref[...]
        if compute_dtype is not None:
            x = x.astype(compute_dtype)
        return jnp.dot(x, a_ref[...], preferred_element_type=jnp.float32)

    def matmul2(h, b_ref, bias_ref, o_ref):
        if compute_dtype is not None:
            h = h.astype(compute_dtype)
        y = jnp.dot(h, b_ref[...], preferred_element_type=jnp.float32)
        if bias_ref is not None:
            y = y + bias_ref[...]
        o_ref[...] = y.astype(o_ref.dtype)

    if multi_n:
        def kernel(*refs):
            if has_bias:
                x_ref, a_ref, b_ref, bias_ref, o_ref, h_ref = refs
            else:
                x_ref, a_ref, b_ref, o_ref, h_ref = refs
                bias_ref = None

            # matmul-1 contracts over in_features and dominates when
            # in_features >> rank: compute it once per batch tile and reuse
            # across N tiles (x block index is constant in j, so no re-DMA).
            @pl.when(pl.program_id(1) == 0)
            def _():
                h_ref[...] = matmul1(x_ref, a_ref)

            matmul2(h_ref[...], b_ref, bias_ref, o_ref)
    else:
        def kernel(*refs):
            if has_bias:
                x_ref, a_ref, b_ref, bias_ref, o_ref = refs
            else:
                x_ref, a_ref, b_ref, o_ref = refs
                bias_ref = None
            matmul2(matmul1(x_ref, a_ref), b_ref, bias_ref, o_ref)

    return kernel


def low_rank_linear(x, w1, w2, bias=None, *, symmetric=False,
                    block_m=512, block_n=1024, compute_dtype=None,
                    vmem_budget_bytes=None):
    """Pallas forward of LowRankLinear.

    x:    (..., in_features)
    w1:   (rank, in_features)      -- linear1.weight (unused if symmetric)
    w2:   (out_features, rank)     -- linear2.weight
    bias: (out_features,) or None  -- linear2.bias
    compute_dtype: e.g. jnp.bfloat16 to run the MXU matmuls in bf16 (f32 acc).
    """
    in_features = x.shape[-1]
    out_features, rank = w2.shape
    _validate_linear_input(in_features, out_features, rank, symmetric)

    lead = x.shape[:-1]
    x2d = x.reshape(-1, in_features)
    batch = x2d.shape[0]
    itemsize = jnp.dtype(x2d.dtype).itemsize

    vmem_budget, vmem_cap = _vmem_policy()
    if vmem_budget_bytes is not None:
        vmem_budget = int(vmem_budget_bytes)

    # ---- tile sizing ----
    # Lane-dense output: pad out_features only to a multiple of 128.
    out_p = _round_up(out_features, 128)

    bm = _round_up(min(block_m, _round_up(batch, 8)), 8)

    # Single N tile whenever the double-buffered x / y streaming tiles fit the
    # budget; tile N only for very large out_features.
    bn_cap = _round_up(max(min(block_n, out_p), 128), 128)
    if out_p <= bn_cap or 2 * bm * (in_features + out_p) * itemsize <= vmem_budget:
        bn = out_p
    else:
        bn = _pick_bn(out_p, bn_cap)

    # Shrink bm to fit the streaming budget; prefer multiples of 256 (MXU).
    while bm > 8 and 2 * bm * (in_features + bn) * itemsize > vmem_budget:
        if bm > 256:
            bm = max(256, (bm // 2) // 256 * 256)
        else:
            bm = max(8, (bm // 2) // 8 * 8)

    grid = (pl.cdiv(batch, bm), out_p // bn)
    multi_n = grid[1] > 1

    # ---- operand prep: pre-transposed, pre-cast weights (tiny, one-time) ----
    a = w2 if symmetric else jnp.transpose(w1)        # (in_features, rank)
    w2t = jnp.transpose(w2)                           # (rank, out_features)
    if out_p != out_features:
        w2t = jnp.pad(w2t, ((0, 0), (0, out_p - out_features)))

    if compute_dtype is not None:
        a = a.astype(compute_dtype)
        w2t = w2t.astype(compute_dtype)
    else:
        # Normalize weight dtype to the activation dtype (avoid implicit
        # mixed-precision promotion inside the kernel).
        if a.dtype != x2d.dtype:
            a = a.astype(x2d.dtype)
        if w2t.dtype != x2d.dtype:
            w2t = w2t.astype(x2d.dtype)

    has_bias = bias is not None
    inputs = [x2d, a, w2t]
    in_specs = [
        pl.BlockSpec((bm, in_features), lambda i, j: (i, 0)),   # streamed x tile
        pl.BlockSpec(a.shape, lambda i, j: (0, 0)),             # resident factor
        pl.BlockSpec((rank, bn), lambda i, j: (0, j)),          # lane-dense W2^T stripe
    ]
    if has_bias:
        b2 = bias.astype(jnp.float32).reshape(1, out_features)
        if out_p != out_features:
            b2 = jnp.pad(b2, ((0, 0), (0, out_p - out_features)))
        inputs.append(b2)
        in_specs.append(pl.BlockSpec((1, bn), lambda i, j: (0, j)))

    out_spec = pl.BlockSpec((bm, bn), lambda i, j: (i, j))

    scratch_shapes = []
    if multi_n:
        scratch_shapes.append(pltpu.VMEM((bm, rank), jnp.float32))

    # ---- VMEM limit estimate, including (8,128) physical padding ----
    a_isz = jnp.dtype(a.dtype).itemsize
    w_isz = jnp.dtype(w2t.dtype).itemsize
    est = (2 * _padded_bytes(bm, in_features, itemsize)            # x stream (x2)
           + 2 * _padded_bytes(bm, bn, itemsize)                   # y stream (x2)
           + 2 * _padded_bytes(a.shape[0], a.shape[1], a_isz)      # resident factor
           + 2 * _padded_bytes(rank, bn, w_isz)                    # w2 stripe
           + (2 * _padded_bytes(1, bn, 4) if has_bias else 0)      # bias
           + _padded_bytes(bm, rank, 4)                            # h scratch
           + _padded_bytes(bm, bn, 4) + _padded_bytes(bm, rank, 4))  # f32 temps
    vmem_limit = int(min(max(2 * est, 32 * 2 ** 20), vmem_cap))

    kernel = _make_kernel(has_bias, compute_dtype, multi_n)
    out = pl.pallas_call(
        kernel,
        out_shape=jax.ShapeDtypeStruct((batch, out_p), x.dtype),
        grid_spec=pltpu.PrefetchScalarGridSpec(
            num_scalar_prefetch=0,
            grid=grid,
            in_specs=in_specs,
            out_specs=out_spec,
            scratch_shapes=scratch_shapes,
        ),
        compiler_params=pltpu.CompilerParams(
            dimension_semantics=("parallel", "arbitrary"),
            vmem_limit_bytes=vmem_limit,
        ),
    )(*inputs)

    y = out if out_p == out_features else out[:, :out_features]
    return y.reshape(*lead, out_features)


def reference_forward(x, w1, w2, bias, *, symmetric=False):
    h = x @ w2 if symmetric else x @ w1.T
    y = h @ w2.T
    if bias is not None:
        y = y + bias
    return y


if __name__ == "__main__":
    key = jax.random.PRNGKey(0)

    # ---- config 1: in=32, out=32, rank=8 (satisfies validate_linear_input) ----
    batch, in_f, out_f, rank = 64, 32, 32, 8
    kx, k1, k2, kb = jax.random.split(key, 4)
    x = jax.random.normal(kx, (batch, in_f), dtype=jnp.float32)
    w1 = jax.random.normal(k1, (rank, in_f), dtype=jnp.float32) * 0.1
    w2 = jax.random.normal(k2, (out_f, rank), dtype=jnp.float32) * 0.1
    bias = jax.random.normal(kb, (out_f,), dtype=jnp.float32) * 0.1

    y = low_rank_linear(x, w1, w2, bias, symmetric=False)
    jax.block_until_ready(y)
    y_ref = reference_forward(x, w1, w2, bias, symmetric=False)
    assert y.shape == y_ref.shape
    assert jnp.allclose(y, y_ref, atol=1e-4, rtol=1e-4), "non-symmetric mismatch"

    y_sym = low_rank_linear(x, w1, w2, bias, symmetric=True)
    jax.block_until_ready(y_sym)
    y_sym_ref = reference_forward(x, w1, w2, bias, symmetric=True)
    assert jnp.allclose(y_sym, y_sym_ref, atol=1e-4, rtol=1e-4), "symmetric mismatch"

    y_nb = low_rank_linear(x, w1, w2, None, symmetric=False)
    jax.block_until_ready(y_nb)
    y_nb_ref = reference_forward(x, w1, w2, None, symmetric=False)
    assert jnp.allclose(y_nb, y_nb_ref, atol=1e-4, rtol=1e-4), "bias=None mismatch"

    y_bf16 = low_rank_linear(x, w1, w2, bias, symmetric=False,
                             compute_dtype=jnp.bfloat16)
    jax.block_until_ready(y_bf16)
    assert jnp.allclose(y_bf16, y_ref, atol=5e-2, rtol=5e-2), "bf16 compute mismatch"

    # ---- config 2: ragged batch tile (600 % 512 != 0), no over-padding of N ----
    batch2, in2, out2, rank2 = 600, 320, 640, 16
    kx2, k12, k22, kb2 = jax.random.split(jax.random.PRNGKey(0), 4)
    x2 = jax.random.normal(kx2, (batch2, in2), dtype=jnp.float32)
    w1b = jax.random.normal(k12, (rank2, in2), dtype=jnp.float32) * 0.1
    w2b = jax.random.normal(k22, (out2, rank2), dtype=jnp.float32) * 0.1
    bias2 = jax.random.normal(kb2, (out2,), dtype=jnp.float32) * 0.1

    y2 = low_rank_linear(x2, w1b, w2b, bias2, symmetric=False)
    jax.block_until_ready(y2)
    y2_ref = reference_forward(x2, w1b, w2b, bias2, symmetric=False)
    assert jnp.allclose(y2, y2_ref, atol=1e-3, rtol=1e-3), "ragged-batch mismatch"

    # ---- config 3: force the multi-N-tile path (matmul-1 reuse via scratch) ----
    y2_multi = low_rank_linear(x2, w1b, w2b, bias2, symmetric=False,
                               block_n=128, vmem_budget_bytes=512 * 1024)
    jax.block_until_ready(y2_multi)
    assert jnp.allclose(y2_multi, y2_ref, atol=1e-3, rtol=1e-3), "multi-N mismatch"

    # ---- leading-dims path ----
    y3 = low_rank_linear(x2.reshape(4, 150, in2), w1b, w2b, bias2)
    jax.block_until_ready(y3)
    assert y3.shape == (4, 150, out2)
    assert jnp.allclose(y3.reshape(batch2, out2), y2, atol=1e-5, rtol=1e-5)

    print("KERNEL_OK")
</pallas_src>

<mosaic_0001>
module attributes {stable_mosaic.version = 11 : i64} {
  func.func @kernel(%arg0: i32, %arg1: i32, %arg2: memref<64x32xf32, #tpu.memory_space<vmem>>, %arg3: memref<32x8xf32, #tpu.memory_space<vmem>>, %arg4: memref<8x128xf32, #tpu.memory_space<vmem>>, %arg5: memref<1x128xf32, #tpu.memory_space<vmem>>, %arg6: memref<64x128xf32, #tpu.memory_space<vmem>>) attributes {dimension_semantics = [#tpu.dimension_semantics<parallel>, #tpu.dimension_semantics<arbitrary>], iteration_bounds = array<i64: 1, 1>, scalar_prefetch = 0 : i64, scratch_operands = 0 : i64, tpu.core_type = #tpu.core_type<tc>, window_params = [{transform_indices = @transform_0, window_bounds = array<i64: 64, 32>}, {pipeline_mode = #tpu.pipeline_mode<synchronous>, transform_indices = @transform_1, window_bounds = array<i64: 32, 8>}, {transform_indices = @transform_2, window_bounds = array<i64: 8, 128>}, {transform_indices = @transform_3, window_bounds = array<i64: 1, 128>}, {transform_indices = @transform_4, window_bounds = array<i64: 64, 128>}]} {
    %c0 = arith.constant 0 : index
    %c0_0 = arith.constant 0 : index
    %0 = vector.load %arg2[%c0, %c0_0] : memref<64x32xf32, #tpu.memory_space<vmem>>, vector<64x32xf32>
    %c0_1 = arith.constant 0 : index
    %c0_2 = arith.constant 0 : index
    %1 = vector.load %arg3[%c0_1, %c0_2] : memref<32x8xf32, #tpu.memory_space<vmem>>, vector<32x8xf32>
    %cst = arith.constant dense<0.000000e+00> : vector<64x8xf32>
    %2 = tpu.matmul %0, %1, %cst {dimension_numbers = #tpu.dot_dimension_numbers<[1], [0], [0], [1], [0, 0, 1, 1], [], []>} : vector<64x32xf32>, vector<32x8xf32>, vector<64x8xf32> -> vector<64x8xf32>
    %c0_3 = arith.constant 0 : index
    %c0_4 = arith.constant 0 : index
    %3 = vector.load %arg4[%c0_3, %c0_4] : memref<8x128xf32, #tpu.memory_space<vmem>>, vector<8x128xf32>
    %cst_5 = arith.constant dense<0.000000e+00> : vector<64x128xf32>
    %4 = tpu.matmul %2, %3, %cst_5 {dimension_numbers = #tpu.dot_dimension_numbers<[1], [0], [0], [1], [0, 0, 1, 1], [], []>} : vector<64x8xf32>, vector<8x128xf32>, vector<64x128xf32> -> vector<64x128xf32>
    %c0_6 = arith.constant 0 : index
    %c0_7 = arith.constant 0 : index
    %5 = vector.load %arg5[%c0_6, %c0_7] : memref<1x128xf32, #tpu.memory_space<vmem>>, vector<1x128xf32>
    %6 = vector.broadcast %5 : vector<1x128xf32> to vector<64x128xf32>
    %7 = arith.addf %4, %6 : vector<64x128xf32>
    %c0_8 = arith.constant 0 : index
    %c0_9 = arith.constant 0 : index
    %8 = vector.load %arg6[%c0_8, %c0_9] : memref<64x128xf32, #tpu.memory_space<vmem>>, vector<64x128xf32>
    tpu.vector_store %arg6[%c0_8, %c0_9], %7 {strides = array<i32>} : memref<64x128xf32, #tpu.memory_space<vmem>>, vector<64x128xf32>,
    return
  }
  func.func @transform_0(%arg0: i32, %arg1: i32) -> (i32, i32) {
    %c0_i32 = arith.constant 0 : i32
    %c0_i32_0 = arith.constant 0 : i32
    return %arg0, %c0_i32 : i32, i32
  }
  func.func @transform_1(%arg0: i32, %arg1: i32) -> (i32, i32) {
    %c0_i32 = arith.constant 0 : i32
    %c0_i32_0 = arith.constant 0 : i32
    %c0_i32_1 = arith.constant 0 : i32
    return %c0_i32, %c0_i32_0 : i32, i32
  }
  func.func @transform_2(%arg0: i32, %arg1: i32) -> (i32, i32) {
    %c0_i32 = arith.constant 0 : i32
    %c0_i32_0 = arith.constant 0 : i32
    return %c0_i32, %arg1 : i32, i32
  }
  func.func @transform_3(%arg0: i32, %arg1: i32) -> (i32, i32) {
    %c0_i32 = arith.constant 0 : i32
    %c0_i32_0 = arith.constant 0 : i32
    return %c0_i32, %arg1 : i32, i32
  }
  func.func @transform_4(%arg0: i32, %arg1: i32) -> (i32, i32) {
    %c0_i32 = arith.constant 0 : i32
    return %arg0, %arg1 : i32, i32
  }
}

</mosaic_0001>

<bundles_post_ra>
// kernel: tpu_custom_call.1
= control target key start
LH: loop header
LB: loop body
LE: loop exit
PB: predicated region body
PF: predicated region fallthrough
CT: control target
= control target key end

     0   :  { %vm30_vm0 = vcmask 261120   ;;  %s527_s0 = inlined_call_operand.vmem [shape: f32[64,32], index: 0, kind: input, shape index: {}]   ;;  %s528_s1 = inlined_call_operand.vmem [shape: f32[32,8], index: 1, kind: input, shape index: {}]   ;;  %s529_s2 = inlined_call_operand.vmem [shape: f32[8,128], index: 2, kind: input, shape index: {}]   ;;  %s530_s3 = inlined_call_operand.vmem [shape: f32[1,128], index: 3, kind: input, shape index: {}]   ;;  %s531_s4 = inlined_call_operand.hbm [shape: f32[64,128], index: 4, kind: output, shape index: {}]  }
   0x1   :  { %v26_v0 = vld [vmem:[%s528_s1] sm:$0xff]  ;;  %v27_v1 = vld [vmem:[%s528_s1 + $0x8] sm:$0xff]  ;;  %v28_v2 = vld [vmem:[%s528_s1 + $0x10] sm:$0xff] }
   0x2   :  { %v394_v3 = vpack.c.bf16 %v27_v1, %v26_v0  ;;  %v29_v4 = vld [vmem:[%s528_s1 + $0x18] sm:$0xff]  ;;  %v18_v5 = vld [vmem:[%s527_s0] sm:$0xff] }
   0x3   :  { %v398_v6 = vpack.c.bf16 %v29_v4, %v28_v2  ;;  %368 = vmatprep.mubr.msk.f32.mxu0 %vm30_vm0, %v18_v5 }
   0x4   :  { %395 = vmatprep.subr.bf16.mxu0 %v394_v3 }
   0x5   :  { %397 = vmatpush3.bf16.msra.mxu0 %v394_v3 }
   0x6   :  { %9 = vsyncpa [#allocation3], 0  ;;  %399 = vmatprep.subr.bf16.mxu0 %v398_v6  ;;  %v19_v7 = vld [vmem:[%s527_s0 + $0x8] sm:$0xff]  ;;  %v20_v8 = vld [vmem:[%s527_s0 + $0x10] sm:$0xff]  ;;  %vm168_vm1 = vcmask 64512   ;;  %s429_s14 = smov [#allocation2]  }
   0x7   :  { %v21_v9 = vld [vmem:[%s527_s0 + $0x18] sm:$0xff]  ;;  %v22_v10 = vld [vmem:[%s527_s0 + $0x20] sm:$0xff]  ;;  %v23_v11 = vld [vmem:[%s527_s0 + $0x28] sm:$0xff]  ;;  %s311_s15 = sshll.u32 %s429_s14, 4  ;;  %s312_s15 = int_to_ptr.vmem [resolvable:$true] %s311_s15 }
   0x8   :  { %v24_v12 = vld [vmem:[%s527_s0 + $0x30] sm:$0xff]  ;;  %v25_v13 = vld [vmem:[%s527_s0 + $0x38] sm:$0xff]  ;;  %v160_v14 = vld [vmem:[%s529_s2] sm:$0xff]  ;;  %p410_p1 = scmp.lt.s32.totalorder %s312_s15, %s312_s15 }
   0x9   :  { %401 = vmatpush3.bf16.msra.mxu0 %v398_v6  ;;  %380 = vmatprep.subr.mxu1 %v160_v14  ;;  %v330_v23 = vld [vmem:[%s530_s3] ss:$0 sm:$0xff]  ;;  %s405_s3 = scalar_lea.vmem %s312_s15, 1024 }
   0xa   :  { %381 = vmatpush3.msra.mxu1 %v160_v14  ;;  %p406_p0 = scmp.ne.s32.totalorder %s312_s15, %s405_s3  ;;  %p411_p2 = scmp.lt.s32.totalorder %s405_s3, %s405_s3 }
   0xc   :  { %369 = vmatmul.mubr.msk.f32.vlgmr.msra.gmra.mrb[0].mxu0 %vm30_vm0, %v19_v7  ;;  %p412_p3 = por %p411_p2, %p410_p1 }
   0xd   :  { %371 = vmatprep.mubr.msk.f32.mxu0 %vm30_vm0, %v20_v8 }
   0xe   :  { %p413_p4 = pnand %p412_p3, %p406_p0 }
  0x10   :  { %372 = vmatmul.mubr.msk.f32.gmra.mrb[2].mxu0 %vm30_vm0, %v21_v9 }
  0x11   :  { %374 = vmatprep.mubr.msk.f32.mxu0 %vm30_vm0, %v22_v10 }
  0x14   :  { %375 = vmatmul.mubr.msk.f32.gmra.mrb[4].mxu0 %vm30_vm0, %v23_v11 }
  0x15   :  { %377 = vmatprep.mubr.msk.f32.mxu0 %vm30_vm0, %v24_v12 }
  0x18   :  { %378 = vmatmul.mubr.msk.f32.gmra.mrb[6].mxu0 %vm30_vm0, %v25_v13 }
  0xdf   :  { %v370_v15 = vpop.f32.mrb[0].mxu0 }
  0xe0   :  { %v121_v16 = vpop.f32.mrb[1].mxu0 }
  0xe1   :  { %382 = vmatprep.mubr.msk.f32.mxu1 %vm168_vm1, %v121_v16 }
  0xe2   :  { %383 = vmatmul.mubr.msk.f32.vlgmr.msra.gmra.mrb[0].mxu1 %vm168_vm1, %v370_v15 }
  0xe3   :  { %v373_v17 = vpop.f32.mrb[2].mxu0 }
  0xe4   :  { %v131_v18 = vpop.f32.mrb[3].mxu0 }
  0xe5   :  { %385 = vmatprep.mubr.msk.f32.mxu1 %vm168_vm1, %v131_v18 }
  0xe6   :  { %386 = vmatmul.mubr.msk.f32.gmra.mrb[2].mxu1 %vm168_vm1, %v373_v17 }
  0xe7   :  { %v376_v19 = vpop.f32.mrb[4].mxu0 }
  0xe8   :  { %v141_v20 = vpop.f32.mrb[5].mxu0 }
  0xe9   :  { %388 = vmatprep.mubr.msk.f32.mxu1 %vm168_vm1, %v141_v20 }
  0xea   :  { %389 = vmatmul.mubr.msk.f32.gmra.mrb[4].mxu1 %vm168_vm1, %v376_v19 }
  0xeb   :  { %v379_v21 = vpop.f32.mrb[6].mxu0 }
  0xec   :  { %v151_v22 = vpop.f32.mrb[7].mxu0 }
  0xed   :  { %391 = vmatprep.mubr.msk.f32.mxu1 %vm168_vm1, %v151_v22 }
  0xee   :  { %392 = vmatmul.mubr.msk.f32.gmra.mrb[6].mxu1 %vm168_vm1, %v379_v21 }
 0x1b5   :  { %v384_v24 = vpop.f32.mrb[0].mxu1 }
 0x1b6   :  { %v265_v25 = vadd.f32 %v384_v24, %v330_v23  ;;  %v259_v26 = vpop.f32.mrb[1].mxu1 }
 0x1b7   :  { %v260_v27 = vadd.f32 %v330_v23, %v259_v26 }
 0x1b8   :  { %299 = vst [vmem:[#allocation2 + $0x8] sm:$0xff] %v265_v25 }
 0x1b9   :  { %298 = vst [vmem:[#allocation2] sm:$0xff] %v260_v27  ;;  %v387_v28 = vpop.f32.mrb[2].mxu1 }
 0x1ba   :  { %v275_v29 = vadd.f32 %v387_v28, %v330_v23  ;;  %v269_v30 = vpop.f32.mrb[3].mxu1 }
 0x1bb   :  { %v270_v31 = vadd.f32 %v330_v23, %v269_v30 }
 0x1bc   :  { %301 = vst [vmem:[#allocation2 + $0x18] sm:$0xff] %v275_v29 }
 0x1bd   :  { %300 = vst [vmem:[#allocation2 + $0x10] sm:$0xff] %v270_v31  ;;  %v390_v32 = vpop.f32.mrb[4].mxu1 }
 0x1be   :  { %v285_v33 = vadd.f32 %v390_v32, %v330_v23  ;;  %v279_v34 = vpop.f32.mrb[5].mxu1 }
 0x1bf   :  { %v280_v35 = vadd.f32 %v330_v23, %v279_v34 }
 0x1c0   :  { %303 = vst [vmem:[#allocation2 + $0x28] sm:$0xff] %v285_v33 }
 0x1c1   :  { %302 = vst [vmem:[#allocation2 + $0x20] sm:$0xff] %v280_v35  ;;  %v393_v36 = vpop.f32.mrb[6].mxu1 }
 0x1c2   :  { %v295_v37 = vadd.f32 %v393_v36, %v330_v23  ;;  %v289_v38 = vpop.f32.mrb[7].mxu1 }
 0x1c3   :  { %v290_v39 = vadd.f32 %v330_v23, %v289_v38 }
 0x1c4   :  { %305 = vst [vmem:[#allocation2 + $0x38] sm:$0xff] %v295_v37 }
 0x1c5   :  { %304 = vst [vmem:[#allocation2 + $0x30] sm:$0xff] %v290_v39 }
 0x1c6   :  { %416 = shalt.err (!%p413_p4)
}
 0x1c7   :  { %s417_s18 = scalar_lea.hbm %s531_s4, 1024 }
 0x1c8   :  { %p418_p5 = scmp.ne.s32.totalorder %s531_s4, %s417_s18  ;;  %p421_p6 = scmp.lt.u32.totalorder %s417_s18, %s531_s4 }
 0x1ca   :  { %p423_p7 = pnand %p421_p6, %p418_p5 }
 0x1cc   :  { %426 = shalt.err (!%p423_p7)
}
 0x1cd   :  { %s430_s23 = smov 128   ;;  %s431_s24 = smov 8  }
 0x1ce   :  { %317 = dma.vmem_to_hbm [thread:$0]  %s312_s15, 1024, %s531_s4, [#allocation3], %s430_s23, %s430_s23, %s431_s24  }
 0x1cf   :  { %427 = dma.done.wait [#allocation3], 1024  }
 0x1d0   :  { %428 = vsyncadd [#allocation3], 4294966272 }
 0x1d1   :  { %321 = vsyncpa [#allocation3], 1 }

</bundles_post_ra>
